<compile_context>
chip_gen: v7x
topology: tpu7x:2x2x1
jax: 0.10.0
libtpu: 0.0.40
codegen_flags: <defaults>
</compile_context>

<pallas_src>
import functools

import jax
import jax.numpy as jnp
from jax.experimental import pallas as pl
from jax.experimental.pallas import tpu as pltpu

LANE = 128  # every layer's output width padded to one full lane group


def _mlp_kernel(x_ref,
                w1_ref, b1_ref,
                w2_ref, b2_ref,
                w3_ref, b3_ref,
                w4_ref, b4_ref,
                w5_ref, b5_ref,
                o_ref):
    """Fused 5-layer MLP on one batch tile: bf16 matmuls, f32 accumulation."""
    # In-kernel f32 -> bf16 cast (saves a full wrapper-side HBM pass over x).
    h = x_ref[...].astype(jnp.bfloat16)

    h = jnp.dot(h, w1_ref[...], preferred_element_type=jnp.float32) + b1_ref[...]
    h = jnp.maximum(h, 0.0)

    h = jnp.dot(h.astype(jnp.bfloat16), w2_ref[...],
                preferred_element_type=jnp.float32) + b2_ref[...]
    h = jnp.maximum(h, 0.0)

    h = jnp.dot(h.astype(jnp.bfloat16), w3_ref[...],
                preferred_element_type=jnp.float32) + b3_ref[...]
    h = jnp.maximum(h, 0.0)

    # nn.Dropout(0.5) in eval mode == identity (no-op).

    h = jnp.dot(h.astype(jnp.bfloat16), w4_ref[...],
                preferred_element_type=jnp.float32) + b4_ref[...]
    h = jnp.maximum(h, 0.0)

    h = jnp.dot(h.astype(jnp.bfloat16), w5_ref[...],
                preferred_element_type=jnp.float32) + b5_ref[...]

    o_ref[...] = h.astype(o_ref.dtype)  # bf16, lane-dense unmasked store


def _pad_to(arr, shape):
    pads = [(0, s - d) for d, s in zip(arr.shape, shape)]
    return jnp.pad(arr, pads)


def _round_up(n, m):
    return ((n + m - 1) // m) * m


def prepare_params(params):
    """One-time (outside jit) pad-to-128-lanes + bf16 cast of the weights.

    params: list of (W, b) with W (in, out), b (1, out).
    Returns a flat tuple (W1, b1, ..., W5, b5): W* bf16 (prev, 128), b* f32 (1, 128).
    Padded lanes stay exactly 0 through bias-add and ReLU, so results match.
    """
    flat = []
    prev = params[0][0].shape[0]
    for (w, b) in params:
        w_p = _pad_to(w, (prev, LANE)).astype(jnp.bfloat16)
        b_p = _pad_to(b, (1, LANE)).astype(jnp.float32)
        flat.extend([w_p, b_p])
        prev = LANE  # from layer 2 on the kernel-visible input width is 128
    return tuple(flat)


def _choose_block_batch(B, block_batch):
    """Batch tile size: amortize per-step overhead, but keep >= 2 grid steps
    when the batch allows it (v7x has 2 TensorCores to feed)."""
    if B <= 8:
        return B  # single tiny step; bb == full array dim is always legal
    return min(block_batch, _round_up(-(-B // 2), 8))


@functools.partial(jax.jit, static_argnames=("out_size", "block_batch"))
def linear_net_forward(x, flat_params, *, out_size, block_batch=2048):
    """x: (B, input_size) f32.  flat_params: output of prepare_params()."""
    B, in_feat = x.shape

    bb = _choose_block_batch(B, block_batch)
    grid = (pl.cdiv(B, bb),)  # ragged last block is masked by Pallas

    # x: tiled over batch; weights/biases: full-array blocks, same block every
    # grid step (invariant operands stay resident in VMEM).
    in_specs = [pl.BlockSpec((bb, in_feat), lambda i: (i, 0))]
    in_specs += [pl.BlockSpec(a.shape, lambda i: (0, 0)) for a in flat_params]
    out_specs = pl.BlockSpec((bb, LANE), lambda i: (i, 0))

    # VMEM budget: double-buffered x/out tiles + resident weights + headroom
    # for in-flight f32 intermediates.  Capped well under v7x's 64 MiB/TC.
    param_bytes = sum(a.size * a.dtype.itemsize for a in flat_params)
    vmem_est = (2 * bb * in_feat * 4          # x tiles (f32, double-buffered)
                + 2 * bb * LANE * 2           # out tiles (bf16, double-buffered)
                + param_bytes                 # resident weights/biases
                + 4 * bb * LANE * 4)          # f32 intermediates
    vmem_limit = int(min(max(2 * vmem_est, 16 * 1024 * 1024), 48 * 1024 * 1024))

    # Advisory cost estimate (helps XLA schedule around the custom call).
    flops = 2 * B * (in_feat * LANE + 4 * LANE * LANE)
    bytes_accessed = x.size * 4 + param_bytes + B * LANE * 2
    cost = pl.CostEstimate(flops=flops, transcendentals=0,
                           bytes_accessed=int(bytes_accessed))

    out = pl.pallas_call(
        _mlp_kernel,
        out_shape=jax.ShapeDtypeStruct((B, LANE), jnp.bfloat16),
        grid_spec=pltpu.PrefetchScalarGridSpec(
            num_scalar_prefetch=0,
            grid=grid,
            in_specs=in_specs,
            out_specs=out_specs,
        ),
        compiler_params=pltpu.CompilerParams(
            dimension_semantics=("parallel",),
            vmem_limit_bytes=vmem_limit,
        ),
        cost_estimate=cost,
    )(x, *flat_params)

    # Slice out the real columns; tiny op (B x out_size), cast back to f32.
    return out[:, :out_size].astype(jnp.float32)


def init_params(key, input_size, output_size):
    """Deterministic init mirroring torch.nn.Linear's U(-1/sqrt(in), 1/sqrt(in))."""
    dims = [input_size, 24, 48, 36, 12, output_size]
    params = []
    for i in range(len(dims) - 1):
        fan_in, fan_out = dims[i], dims[i + 1]
        key, kw, kb = jax.random.split(key, 3)
        bound = 1.0 / (fan_in ** 0.5)
        w = jax.random.uniform(kw, (fan_in, fan_out), jnp.float32, -bound, bound)
        b = jax.random.uniform(kb, (1, fan_out), jnp.float32, -bound, bound)
        params.append((w, b))
    return params


def reference_forward_f32(x, params):
    """Pure-f32 reference (PyTorch eval-mode semantics)."""
    h = x
    for i, (w, b) in enumerate(params):
        h = h @ w + b
        if i < len(params) - 1:
            h = jnp.maximum(h, 0.0)
    return h


def reference_forward_bf16(x, params):
    """Reference matching the kernel's dtype regime (bf16 operands, f32 accum)."""
    h = x.astype(jnp.bfloat16)
    for i, (w, b) in enumerate(params):
        h = jnp.dot(h.astype(jnp.bfloat16), w.astype(jnp.bfloat16),
                    preferred_element_type=jnp.float32) + b.astype(jnp.float32)
        if i < len(params) - 1:
            h = jnp.maximum(h, 0.0)
    return h


if __name__ == "__main__":
    input_size = 32
    output_size = 12

    key = jax.random.PRNGKey(0)
    kx, kp, kx2 = jax.random.split(key, 3)
    params = init_params(kp, input_size, output_size)
    flat_params = prepare_params(params)   # one-time, outside the jitted forward

    # Case 1: small batch (16) -> 2 grid steps of 8 rows each.
    batch = 16
    x = jax.random.normal(kx, (batch, input_size), dtype=jnp.float32)
    out = jax.block_until_ready(
        linear_net_forward(x, flat_params, out_size=output_size))
    assert out.shape == (batch, output_size), out.shape
    ref_bf16 = reference_forward_bf16(x, params)
    ref_f32 = reference_forward_f32(x, params)
    assert jnp.allclose(out, ref_bf16, atol=3e-2, rtol=3e-2), "mismatch vs bf16 reference"
    assert jnp.allclose(out, ref_f32, atol=1.5e-1, rtol=1.5e-1), "mismatch vs f32 reference"

    # Case 2: ragged batch (300, not a multiple of the tile) -> masked last block.
    batch2 = 300
    x2 = jax.random.normal(kx2, (batch2, input_size), dtype=jnp.float32)
    out2 = jax.block_until_ready(
        linear_net_forward(x2, flat_params, out_size=output_size, block_batch=128))
    assert out2.shape == (batch2, output_size), out2.shape
    ref2 = reference_forward_bf16(x2, params)
    assert jnp.allclose(out2, ref2, atol=3e-2, rtol=3e-2), "ragged-batch mismatch"

    print("KERNEL_OK")
</pallas_src>

<mosaic_0001>
module attributes {stable_mosaic.version = 11 : i64} {
  func.func @_mlp_kernel(%arg0: i32, %arg1: memref<8x32xf32, #tpu.memory_space<vmem>>, %arg2: memref<32x128xbf16, #tpu.memory_space<vmem>>, %arg3: memref<1x128xf32, #tpu.memory_space<vmem>>, %arg4: memref<128x128xbf16, #tpu.memory_space<vmem>>, %arg5: memref<1x128xf32, #tpu.memory_space<vmem>>, %arg6: memref<128x128xbf16, #tpu.memory_space<vmem>>, %arg7: memref<1x128xf32, #tpu.memory_space<vmem>>, %arg8: memref<128x128xbf16, #tpu.memory_space<vmem>>, %arg9: memref<1x128xf32, #tpu.memory_space<vmem>>, %arg10: memref<128x128xbf16, #tpu.memory_space<vmem>>, %arg11: memref<1x128xf32, #tpu.memory_space<vmem>>, %arg12: memref<8x128xbf16, #tpu.memory_space<vmem>>) attributes {dimension_semantics = [#tpu.dimension_semantics<parallel>], iteration_bounds = array<i64: 2>, scalar_prefetch = 0 : i64, scratch_operands = 0 : i64, tpu.core_type = #tpu.core_type<tc>, window_params = [{transform_indices = @transform_0, window_bounds = array<i64: 8, 32>}, {pipeline_mode = #tpu.pipeline_mode<synchronous>, transform_indices = @transform_1, window_bounds = array<i64: 32, 128>}, {pipeline_mode = #tpu.pipeline_mode<synchronous>, transform_indices = @transform_2, window_bounds = array<i64: 1, 128>}, {pipeline_mode = #tpu.pipeline_mode<synchronous>, transform_indices = @transform_3, window_bounds = array<i64: 128, 128>}, {pipeline_mode = #tpu.pipeline_mode<synchronous>, transform_indices = @transform_4, window_bounds = array<i64: 1, 128>}, {pipeline_mode = #tpu.pipeline_mode<synchronous>, transform_indices = @transform_5, window_bounds = array<i64: 128, 128>}, {pipeline_mode = #tpu.pipeline_mode<synchronous>, transform_indices = @transform_6, window_bounds = array<i64: 1, 128>}, {pipeline_mode = #tpu.pipeline_mode<synchronous>, transform_indices = @transform_7, window_bounds = array<i64: 128, 128>}, {pipeline_mode = #tpu.pipeline_mode<synchronous>, transform_indices = @transform_8, window_bounds = array<i64: 1, 128>}, {pipeline_mode = #tpu.pipeline_mode<synchronous>, transform_indices = @transform_9, window_bounds = array<i64: 128, 128>}, {pipeline_mode = #tpu.pipeline_mode<synchronous>, transform_indices = @transform_10, window_bounds = array<i64: 1, 128>}, {transform_indices = @transform_11, window_bounds = array<i64: 8, 128>}]} {
    %c0 = arith.constant 0 : index
    %c0_0 = arith.constant 0 : index
    %0 = vector.load %arg1[%c0, %c0_0] : memref<8x32xf32, #tpu.memory_space<vmem>>, vector<8x32xf32>
    %1 = arith.truncf %0 : vector<8x32xf32> to vector<8x32xbf16>
    %c0_1 = arith.constant 0 : index
    %c0_2 = arith.constant 0 : index
    %2 = vector.load %arg2[%c0_1, %c0_2] : memref<32x128xbf16, #tpu.memory_space<vmem>>, vector<32x128xbf16>
    %cst = arith.constant dense<0.000000e+00> : vector<8x128xf32>
    %3 = tpu.matmul %1, %2, %cst {dimension_numbers = #tpu.dot_dimension_numbers<[1], [0], [0], [1], [0, 0, 1, 1], [], []>} : vector<8x32xbf16>, vector<32x128xbf16>, vector<8x128xf32> -> vector<8x128xf32>
    %c0_3 = arith.constant 0 : index
    %c0_4 = arith.constant 0 : index
    %4 = vector.load %arg3[%c0_3, %c0_4] : memref<1x128xf32, #tpu.memory_space<vmem>>, vector<1x128xf32>
    %5 = vector.broadcast %4 : vector<1x128xf32> to vector<8x128xf32>
    %6 = arith.addf %3, %5 : vector<8x128xf32>
    %cst_5 = arith.constant 0.000000e+00 : f32
    %7 = vector.broadcast %cst_5 : f32 to vector<8x128xf32>
    %8 = arith.maximumf %6, %7 : vector<8x128xf32>
    %9 = arith.truncf %8 : vector<8x128xf32> to vector<8x128xbf16>
    %c0_6 = arith.constant 0 : index
    %c0_7 = arith.constant 0 : index
    %10 = vector.load %arg4[%c0_6, %c0_7] : memref<128x128xbf16, #tpu.memory_space<vmem>>, vector<128x128xbf16>
    %cst_8 = arith.constant dense<0.000000e+00> : vector<8x128xf32>
    %11 = tpu.matmul %9, %10, %cst_8 {dimension_numbers = #tpu.dot_dimension_numbers<[1], [0], [0], [1], [0, 0, 1, 1], [], []>} : vector<8x128xbf16>, vector<128x128xbf16>, vector<8x128xf32> -> vector<8x128xf32>
    %c0_9 = arith.constant 0 : index
    %c0_10 = arith.constant 0 : index
    %12 = vector.load %arg5[%c0_9, %c0_10] : memref<1x128xf32, #tpu.memory_space<vmem>>, vector<1x128xf32>
    %13 = vector.broadcast %12 : vector<1x128xf32> to vector<8x128xf32>
    %14 = arith.addf %11, %13 : vector<8x128xf32>
    %cst_11 = arith.constant 0.000000e+00 : f32
    %15 = vector.broadcast %cst_11 : f32 to vector<8x128xf32>
    %16 = arith.maximumf %14, %15 : vector<8x128xf32>
    %17 = arith.truncf %16 : vector<8x128xf32> to vector<8x128xbf16>
    %c0_12 = arith.constant 0 : index
    %c0_13 = arith.constant 0 : index
    %18 = vector.load %arg6[%c0_12, %c0_13] : memref<128x128xbf16, #tpu.memory_space<vmem>>, vector<128x128xbf16>
    %cst_14 = arith.constant dense<0.000000e+00> : vector<8x128xf32>
    %19 = tpu.matmul %17, %18, %cst_14 {dimension_numbers = #tpu.dot_dimension_numbers<[1], [0], [0], [1], [0, 0, 1, 1], [], []>} : vector<8x128xbf16>, vector<128x128xbf16>, vector<8x128xf32> -> vector<8x128xf32>
    %c0_15 = arith.constant 0 : index
    %c0_16 = arith.constant 0 : index
    %20 = vector.load %arg7[%c0_15, %c0_16] : memref<1x128xf32, #tpu.memory_space<vmem>>, vector<1x128xf32>
    %21 = vector.broadcast %20 : vector<1x128xf32> to vector<8x128xf32>
    %22 = arith.addf %19, %21 : vector<8x128xf32>
    %cst_17 = arith.constant 0.000000e+00 : f32
    %23 = vector.broadcast %cst_17 : f32 to vector<8x128xf32>
    %24 = arith.maximumf %22, %23 : vector<8x128xf32>
    %25 = arith.truncf %24 : vector<8x128xf32> to vector<8x128xbf16>
    %c0_18 = arith.constant 0 : index
    %c0_19 = arith.constant 0 : index
    %26 = vector.load %arg8[%c0_18, %c0_19] : memref<128x128xbf16, #tpu.memory_space<vmem>>, vector<128x128xbf16>
    %cst_20 = arith.constant dense<0.000000e+00> : vector<8x128xf32>
    %27 = tpu.matmul %25, %26, %cst_20 {dimension_numbers = #tpu.dot_dimension_numbers<[1], [0], [0], [1], [0, 0, 1, 1], [], []>} : vector<8x128xbf16>, vector<128x128xbf16>, vector<8x128xf32> -> vector<8x128xf32>
    %c0_21 = arith.constant 0 : index
    %c0_22 = arith.constant 0 : index
    %28 = vector.load %arg9[%c0_21, %c0_22] : memref<1x128xf32, #tpu.memory_space<vmem>>, vector<1x128xf32>
    %29 = vector.broadcast %28 : vector<1x128xf32> to vector<8x128xf32>
    %30 = arith.addf %27, %29 : vector<8x128xf32>
    %cst_23 = arith.constant 0.000000e+00 : f32
    %31 = vector.broadcast %cst_23 : f32 to vector<8x128xf32>
    %32 = arith.maximumf %30, %31 : vector<8x128xf32>
    %33 = arith.truncf %32 : vector<8x128xf32> to vector<8x128xbf16>
    %c0_24 = arith.constant 0 : index
    %c0_25 = arith.constant 0 : index
    %34 = vector.load %arg10[%c0_24, %c0_25] : memref<128x128xbf16, #tpu.memory_space<vmem>>, vector<128x128xbf16>
    %cst_26 = arith.constant dense<0.000000e+00> : vector<8x128xf32>
    %35 = tpu.matmul %33, %34, %cst_26 {dimension_numbers = #tpu.dot_dimension_numbers<[1], [0], [0], [1], [0, 0, 1, 1], [], []>} : vector<8x128xbf16>, vector<128x128xbf16>, vector<8x128xf32> -> vector<8x128xf32>
    %c0_27 = arith.constant 0 : index
    %c0_28 = arith.constant 0 : index
    %36 = vector.load %arg11[%c0_27, %c0_28] : memref<1x128xf32, #tpu.memory_space<vmem>>, vector<1x128xf32>
    %37 = vector.broadcast %36 : vector<1x128xf32> to vector<8x128xf32>
    %38 = arith.addf %35, %37 : vector<8x128xf32>
    %39 = arith.truncf %38 : vector<8x128xf32> to vector<8x128xbf16>
    %c0_29 = arith.constant 0 : index
    %c0_30 = arith.constant 0 : index
    %40 = vector.load %arg12[%c0_29, %c0_30] : memref<8x128xbf16, #tpu.memory_space<vmem>>, vector<8x128xbf16>
    tpu.vector_store %arg12[%c0_29, %c0_30], %39 {strides = array<i32>} : memref<8x128xbf16, #tpu.memory_space<vmem>>, vector<8x128xbf16>,
    return
  }
  func.func @transform_0(%arg0: i32) -> (i32, i32) {
    %c0_i32 = arith.constant 0 : i32
    %c0_i32_0 = arith.constant 0 : i32
    return %arg0, %c0_i32 : i32, i32
  }
  func.func @transform_1(%arg0: i32) -> (i32, i32) {
    %c0_i32 = arith.constant 0 : i32
    %c0_i32_0 = arith.constant 0 : i32
    %c0_i32_1 = arith.constant 0 : i32
    return %c0_i32, %c0_i32_0 : i32, i32
  }
  func.func @transform_2(%arg0: i32) -> (i32, i32) {
    %c0_i32 = arith.constant 0 : i32
    %c0_i32_0 = arith.constant 0 : i32
    %c0_i32_1 = arith.constant 0 : i32
    return %c0_i32, %c0_i32_0 : i32, i32
  }
  func.func @transform_3(%arg0: i32) -> (i32, i32) {
    %c0_i32 = arith.constant 0 : i32
    %c0_i32_0 = arith.constant 0 : i32
    %c0_i32_1 = arith.constant 0 : i32
    return %c0_i32, %c0_i32_0 : i32, i32
  }
  func.func @transform_4(%arg0: i32) -> (i32, i32) {
    %c0_i32 = arith.constant 0 : i32
    %c0_i32_0 = arith.constant 0 : i32
    %c0_i32_1 = arith.constant 0 : i32
    return %c0_i32, %c0_i32_0 : i32, i32
  }
  func.func @transform_5(%arg0: i32) -> (i32, i32) {
    %c0_i32 = arith.constant 0 : i32
    %c0_i32_0 = arith.constant 0 : i32
    %c0_i32_1 = arith.constant 0 : i32
    return %c0_i32, %c0_i32_0 : i32, i32
  }
  func.func @transform_6(%arg0: i32) -> (i32, i32) {
    %c0_i32 = arith.constant 0 : i32
    %c0_i32_0 = arith.constant 0 : i32
    %c0_i32_1 = arith.constant 0 : i32
    return %c0_i32, %c0_i32_0 : i32, i32
  }
  func.func @transform_7(%arg0: i32) -> (i32, i32) {
    %c0_i32 = arith.constant 0 : i32
    %c0_i32_0 = arith.constant 0 : i32
    %c0_i32_1 = arith.constant 0 : i32
    return %c0_i32, %c0_i32_0 : i32, i32
  }
  func.func @transform_8(%arg0: i32) -> (i32, i32) {
    %c0_i32 = arith.constant 0 : i32
    %c0_i32_0 = arith.constant 0 : i32
    %c0_i32_1 = arith.constant 0 : i32
    return %c0_i32, %c0_i32_0 : i32, i32
  }
  func.func @transform_9(%arg0: i32) -> (i32, i32) {
    %c0_i32 = arith.constant 0 : i32
    %c0_i32_0 = arith.constant 0 : i32
    %c0_i32_1 = arith.constant 0 : i32
    return %c0_i32, %c0_i32_0 : i32, i32
  }
  func.func @transform_10(%arg0: i32) -> (i32, i32) {
    %c0_i32 = arith.constant 0 : i32
    %c0_i32_0 = arith.constant 0 : i32
    %c0_i32_1 = arith.constant 0 : i32
    return %c0_i32, %c0_i32_0 : i32, i32
  }
  func.func @transform_11(%arg0: i32) -> (i32, i32) {
    %c0_i32 = arith.constant 0 : i32
    %c0_i32_0 = arith.constant 0 : i32
    return %arg0, %c0_i32 : i32, i32
  }
}

</mosaic_0001>

<bundles_post_ra>
// kernel: linear_net_forward.1
= control target key start
LH: loop header
LB: loop body
LE: loop exit
PB: predicated region body
PF: predicated region fallthrough
CT: control target
= control target key end

     0   :  { %s2040_s0 = inlined_call_operand.hbm [shape: f32[16,32], index: 0, kind: input, shape index: {}]   ;;  %s2041_s1 = inlined_call_operand.hbm [shape: bf16[32,128], index: 1, kind: input, shape index: {}]   ;;  %s2042_s2 = inlined_call_operand.vmem [shape: f32[1,128], index: 2, kind: input, shape index: {}]   ;;  %s2043_s3 = inlined_call_operand.hbm [shape: bf16[128,128], index: 3, kind: input, shape index: {}]   ;;  %s2044_s4 = inlined_call_operand.vmem [shape: f32[1,128], index: 4, kind: input, shape index: {}]   ;;  %s2045_s5 = inlined_call_operand.hbm [shape: bf16[128,128], index: 5, kind: input, shape index: {}]   ;;  %s2046_s6 = inlined_call_operand.vmem [shape: f32[1,128], index: 6, kind: input, shape index: {}]   ;;  %s2047_s7 = inlined_call_operand.hbm [shape: bf16[128,128], index: 7, kind: input, shape index: {}]   ;;  %s2048_s8 = inlined_call_operand.vmem [shape: f32[1,128], index: 8, kind: input, shape index: {}]   ;;  %s2049_s9 = inlined_call_operand.hbm [shape: bf16[128,128], index: 9, kind: input, shape index: {}]   ;;  %s2050_s10 = inlined_call_operand.vmem [shape: f32[1,128], index: 10, kind: input, shape index: {}]   ;;  %s2051_s11 = inlined_call_operand.vmem [shape: bf16[16,128], index: 11, kind: output, shape index: {}]  }
   0x1   :  { %2054 = sst [smem:[#allocation16_spill]] %s2041_s1 }
   0x2   :  { %2055 = sst [smem:[#allocation17_spill]] %s2048_s8 }
   0x3   :  { %2056 = sst [smem:[#allocation18_spill]] %s2050_s10 }
   0x4   :  { %2057 = sst [smem:[#allocation19_spill]] %s2051_s11 }
   0x5   :  { %16 = vsyncpa [#allocation3], 0 }
   0x6   :  { %18 = vsyncpa [#allocation3 + $0x1], 0 }
   0x7   :  { %19 = vsyncpa [#allocation5], 0 }
   0x8   :  { %20 = vsyncpa [#allocation8], 0 }
   0x9   :  { %21 = vsyncpa [#allocation11], 0  ;;  %s1715_s17 = smov 0   ;;  %s1717_s18 = smov 0  }
   0xa   :  { %s1719_s19 = smov 0   ;;  %s1721_s20 = smov 0  }
   0xb LB: > { %s1645_s21 = smov [#allocation4]   ;;  %s1736_s23 = sadd.s32 4294967295, %s1643_s20   ;;  %s1643_s20 = sphi %s1721_s20, %s2078_s20   ;;  %s1639_s19 = sphi %s1719_s19, %s2077_s19   ;;  %s1635_s18 = sphi %s1717_s18, %s2076_s18   ;;  %s1631_s17 = sphi %s1715_s17, %s2075_s17  }
   0xc   : > { %s306_s22 = sshll.u32 %s1645_s21, 4  ;;  %p1113_p0 = scmp.ge.s32.totalorder %s1643_s20, 1  ;;  %s1741_s22 = int_to_ptr.vmem [resolvable:$true] %s306_s22 }
   0xd   : > { %p2052_p1 = scmp.eq.s32.totalorder %s1736_s23, 0  ;;  %p294_p2 = scmp.lt.s32.totalorder %s1643_s20, 3 }
   0xe   : > { %s1646_s25 = smov [#allocation7]   ;;  %s1647_s28 = smov [#allocation6]  }
   0xf   : > { %p1743_p3 = pnand %p1113_p0, %p294_p2  ;;  %s338_s26 = sshll.u32 %s1646_s25, 4  ;;  %s1755_s26 = int_to_ptr.vmem [resolvable:$true] %s338_s26 }
  0x10   : > { %s322_s29 = sshll.u32 %s1647_s28, 4  ;;  %s2060_s1 = sld [smem:[#allocation16_spill]]  ;;  %s1757_s29 = int_to_ptr.vmem [resolvable:$true] %s322_s29 }
  0x11   : > { %s2058_s24 = scalar_select %p1743_p3, 1, 0 }
  0x12   : > { %p1321_p4 = pneg %p1743_p3 }
  0x14   : > { %p1751_p5 = pnand %p1321_p4, %p2052_p1 }
  0x16   : > { %s1427_s13 = scalar_lea.hbm %s2060_s1, 256  ;;  %p1767_p7 = pneg %p1751_p5 }
  0x17   : > { %p1428_p6 = scmp.ne.s32.totalorder %s2060_s1, %s1427_s13  ;;  %p1434_p10 = scmp.lt.u32.totalorder %s1427_s13, %s2060_s1 }
  0x19   : > { %p1430_p8 = pnand %p1767_p7, %p1428_p6 }
  0x1b   : > { %p1431_p9 = pneg %p1430_p8 }
  0x1d   : > { %p1436_p11 = pnand %p1434_p10, %p1431_p9 }
  0x1f   : > { %1439 = shalt.err (!%p1436_p11)
}
  0x20   : > { %s1440_s28 = scalar_lea.vmem %s1741_s22, 256  ;;  %p1448_p2 = scmp.lt.s32.totalorder %s1741_s22, %s1741_s22 }
  0x21   : > { %p1441_p12 = scmp.ne.s32.totalorder %s1741_s22, %s1440_s28  ;;  %p1449_p4 = scmp.lt.s32.totalorder %s1440_s28, %s1440_s28 }
  0x23   : > { %p1443_p13 = pnand %p1441_p12, %p1767_p7  ;;  %p1450_p6 = por %p1449_p4, %p1448_p2 }
  0x25   : > { %p1444_p0 = pneg %p1443_p13 }
  0x27   : > { %p1451_p8 = pnand %p1450_p6, %p1444_p0 }
  0x29   : > { %1454 = shalt.err (!%p1451_p8)
}
  0x2a   : > { %s1648_s30 = smov 64   ;;  %s1649_s12 = smov 4  }
  0x2b   : > { %1324 = dma.hbm_to_vmem [thread:$0]  (!%p1751_p5), %s2060_s1, 256, %s1741_s22, [#allocation5], %s1648_s30, %s1648_s30, %s1649_s12  }
  0x2c   : > { %s1455_s25 = scalar_lea.hbm %s2045_s5, 1024 }
  0x2d   : > { %p1456_p9 = scmp.ne.s32.totalorder %s2045_s5, %s1455_s25  ;;  %p1462_p12 = scmp.lt.u32.totalorder %s1455_s25, %s2045_s5 }
  0x2f   : > { %p1458_p10 = pnand %p1456_p9, %p1767_p7 }
  0x31   : > { %p1459_p11 = pneg %p1458_p10 }
  0x33   : > { %p1464_p13 = pnand %p1462_p12, %p1459_p11 }
  0x35   : > { %1467 = shalt.err (!%p1464_p13)
}
  0x36   : > { %s1468_s22 = scalar_lea.vmem %s1755_s26, 1024  ;;  %p1476_p6 = scmp.lt.s32.totalorder %s1755_s26, %s1755_s26 }
  0x37   : > { %p1469_p0 = scmp.ne.s32.totalorder %s1755_s26, %s1468_s22  ;;  %p1477_p8 = scmp.lt.s32.totalorder %s1468_s22, %s1468_s22 }
  0x39   : > { %p1471_p2 = pnand %p1469_p0, %p1767_p7  ;;  %p1478_p9 = por %p1477_p8, %p1476_p6 }
  0x3b   : > { %p1472_p4 = pneg %p1471_p2 }
  0x3d   : > { %p1479_p10 = pnand %p1478_p9, %p1472_p4 }
  0x3f   : > { %1482 = shalt.err (!%p1479_p10)
}
  0x40   : > { %1330 = dma.hbm_to_vmem [thread:$0]  (!%p1751_p5), %s2045_s5, 1024, %s1755_s26, [#allocation8], %s1648_s30, %s1648_s30, %s1649_s12  }
  0x41   : > { %s1483_s14 = scalar_lea.hbm %s2043_s3, 1024 }
  0x42   : > { %p1484_p11 = scmp.ne.s32.totalorder %s2043_s3, %s1483_s14  ;;  %p1490_p0 = scmp.lt.u32.totalorder %s1483_s14, %s2043_s3 }
  0x44   : > { %p1486_p12 = pnand %p1484_p11, %p1767_p7 }
  0x46   : > { %p1487_p13 = pneg %p1486_p12 }
  0x48   : > { %p1492_p2 = pnand %p1490_p0, %p1487_p13 }
  0x4a   : > { %1495 = shalt.err (!%p1492_p2)
}
  0x4b   : > { %s1496_s26 = scalar_lea.vmem %s1757_s29, 1024  ;;  %p1504_p9 = scmp.lt.s32.totalorder %s1757_s29, %s1757_s29 }
  0x4c   : > { %p1497_p4 = scmp.ne.s32.totalorder %s1757_s29, %s1496_s26  ;;  %p1505_p10 = scmp.lt.s32.totalorder %s1496_s26, %s1496_s26 }
  0x4e   : > { %p1499_p6 = pnand %p1497_p4, %p1767_p7  ;;  %p1506_p11 = por %p1505_p10, %p1504_p9 }
  0x50   : > { %p1500_p8 = pneg %p1499_p6 }
  0x52   : > { %p1507_p12 = pnand %p1506_p11, %p1500_p8 }
  0x54   : > { %1510 = shalt.err (!%p1507_p12)
}
  0x55   : > { %1327 = dma.hbm_to_vmem [thread:$0]  (!%p1751_p5), %s2043_s3, 1024, %s1757_s29, [#allocation5], %s1648_s30, %s1648_s30, %s1649_s12  }
  0x56   : > { %s1650_s10 = smov [#allocation9]   ;;  %s1651_s13 = smov [#allocation10]  }
  0x57   : > { %s354_s11 = sshll.u32 %s1650_s10, 4  ;;  %s370_s14 = sshll.u32 %s1651_s13, 4  ;;  %s355_s11 = int_to_ptr.vmem [resolvable:$true] %s354_s11  ;;  %s371_s14 = int_to_ptr.vmem [resolvable:$true] %s370_s14 }
  0x58   : > { %s1511_s25 = scalar_lea.hbm %s2047_s7, 1024 }
  0x59   : > { %p1512_p13 = scmp.ne.s32.totalorder %s2047_s7, %s1511_s25  ;;  %p1518_p4 = scmp.lt.u32.totalorder %s1511_s25, %s2047_s7 }
  0x5b   : > { %p1514_p0 = pnand %p1512_p13, %p1767_p7 }
  0x5d   : > { %p1515_p2 = pneg %p1514_p0 }
  0x5f   : > { %p1520_p6 = pnand %p1518_p4, %p1515_p2 }
  0x61   : > { %1523 = shalt.err (!%p1520_p6)
}
  0x62   : > { %s1524_s29 = scalar_lea.vmem %s355_s11, 1024  ;;  %p1532_p11 = scmp.lt.s32.totalorder %s355_s11, %s355_s11 }
  0x63   : > { %p1525_p8 = scmp.ne.s32.totalorder %s355_s11, %s1524_s29  ;;  %p1533_p12 = scmp.lt.s32.totalorder %s1524_s29, %s1524_s29 }
  0x65   : > { %p1527_p9 = pnand %p1525_p8, %p1767_p7  ;;  %p1534_p1 = por %p1533_p12, %p1532_p11 }
  0x67   : > { %p1528_p10 = pneg %p1527_p9 }
  0x69   : > { %p1535_p3 = pnand %p1534_p1, %p1528_p10 }
  0x6b   : > { %1538 = shalt.err (!%p1535_p3)
}
  0x6c   : > { %1333 = dma.hbm_to_vmem [thread:$0]  (!%p1751_p5), %s2047_s7, 1024, %s355_s11, [#allocation8], %s1648_s30, %s1648_s30, %s1649_s12  }
  0x6d   : > { %s1539_s15 = scalar_lea.hbm %s2049_s9, 1024 }
  0x6e   : > { %p1540_p1 = scmp.ne.s32.totalorder %s2049_s9, %s1539_s15  ;;  %p1546_p0 = scmp.lt.u32.totalorder %s1539_s15, %s2049_s9 }
  0x70   : > { %p1542_p3 = pnand %p1540_p1, %p1767_p7 }
  0x72   : > { %p1543_p13 = pneg %p1542_p3 }
  0x74   : > { %p1548_p2 = pnand %p1546_p0, %p1543_p13 }
  0x76   : > { %1551 = shalt.err (!%p1548_p2)
}
  0x77   : > { %s1552_s22 = scalar_lea.vmem %s371_s14, 1024  ;;  %p1560_p9 = scmp.lt.s32.totalorder %s371_s14, %s371_s14 }
  0x78   : > { %p1553_p4 = scmp.ne.s32.totalorder %s371_s14, %s1552_s22  ;;  %p1561_p10 = scmp.lt.s32.totalorder %s1552_s22, %s1552_s22 }
  0x7a   : > { %p1555_p6 = pnand %p1553_p4, %p1767_p7  ;;  %p1562_p11 = por %p1561_p10, %p1560_p9 }
  0x7c   : > { %p1556_p8 = pneg %p1555_p6 }
  0x7e   : > { %p1563_p12 = pnand %p1562_p11, %p1556_p8 }
  0x80   : > { %1566 = shalt.err (!%p1563_p12)
}
  0x81   : > { %1336 = dma.hbm_to_vmem [thread:$0]  (!%p1751_p5), %s2049_s9, 1024, %s371_s14, [#allocation11], %s1648_s30, %s1648_s30, %s1649_s12  }
  0x82   : > { %s1886_s27 = sadd.s32 1, %s1643_s20   ;;  %s34_s1 = sadd.s32 1, %s1639_s19 }
  0x83   : > { %s31_s16 = ssub.s32 %s1643_s20, %s1886_s27  ;;  %p41_p1 = scmp.ne.s32.totalorder %s1639_s19, %s1635_s18 }
  0x84   : > { %p32_p7 = scmp.eq.s32.totalorder %s31_s16, 0  ;;  %p42_p3 = scmp.eq.s32.totalorder %s1643_s20, 0 }
  0x85   : > { %p47_p13 = scmp.ne.s32.totalorder %s1635_s18, %s1631_s17  ;;  %p2062_p2 = scmp.eq.s32.totalorder %s1736_s23, 0 }
  0x86   : > { %s1897_s8 = scalar_select %p32_p7, %s1639_s19, %s34_s1  }
  0x87   : > { %p43_p0 = por %p42_p3, %p41_p1  ;;  %p1901_p4 = por %p2062_p2, %p47_p13 }
  0x88   : > { %p1346_p6 = scmp.lt.s32.totalorder %s1643_s20, 2  ;;  %s387_s13 = sand.u32 1, %s1639_s19  }
  0x89   : > { %s1120_s30 = sshll.u32 %s387_s13, 3  ;;  %s1121_s12 = sshll.u32 %s1643_s20, 7 }
  0x8a   : > { %s1911_s21 = scalar_lea.hbm %s2040_s0, %s1121_s12  ;;  %s391_s17 = scalar_lea.vmem [#allocation2], %s1120_s30 }
  0x8b   : > { %s398_s25 = sshll.u32 %s391_s17, 4  ;;  %p1915_p5 = pnand %p1346_p6, %p43_p0  ;;  %s1913_s25 = int_to_ptr.vmem [resolvable:$true] %s398_s25 }
  0x8c   : > { %s388_s20 = scalar_lea.sflag [#allocation3], %s387_s13  ;;  %s1567_s26 = scalar_lea.hbm %s1911_s21, 128 }
  0x8d   : > { %p1568_p8 = scmp.ne.s32.totalorder %s1911_s21, %s1567_s26  ;;  %p1569_p9 = pneg %p1915_p5 }
  0x8e   : > { %s1572_s29 = scalar_lea.hbm %s2040_s0, 256  ;;  %p1573_p12 = scmp.lt.u32.totalorder %s1911_s21, %s2040_s0 }
  0x8f   : > { %p1570_p10 = pnand %p1569_p9, %p1568_p8  ;;  %p1574_p7 = scmp.lt.u32.totalorder %s1572_s29, %s1567_s26 }
  0x90   : > { %p1576_p3 = scmp.lt.u32.totalorder %s1567_s26, %s1911_s21 }
  0x91   : > { %p1571_p11 = pneg %p1570_p10  ;;  %p1575_p1 = por %p1574_p7, %p1573_p12 }
  0x93   : > { %p1577_p13 = por %p1576_p3, %p1575_p1 }
  0x95   : > { %p1578_p0 = pnand %p1577_p13, %p1571_p11 }
  0x97   : > { %1581 = shalt.err (!%p1578_p0)
}
  0x98   : > { %s1582_s13 = scalar_lea.vmem %s1913_s25, 128  ;;  %s1652_s30 = smov [#allocation2]  }
  0x99   : > { %p1583_p2 = scmp.ne.s32.totalorder %s1913_s25, %s1582_s13  ;;  %s1587_s12 = sshll.u32 %s1652_s30, 4  ;;  %s1588_s12 = int_to_ptr.vmem [resolvable:$false] %s1587_s12 }
  0x9a   : > { %s1589_s14 = scalar_lea.vmem %s1588_s12, 256  ;;  %p1590_p10 = scmp.lt.s32.totalorder %s1913_s25, %s1588_s12 }
  0x9b   : > { %p1585_p6 = pnand %p1583_p2, %p1569_p9  ;;  %p1591_p12 = scmp.lt.s32.totalorder %s1589_s14, %s1582_s13 }
  0x9d   : > { %p1586_p8 = pneg %p1585_p6  ;;  %p1592_p7 = por %p1591_p12, %p1590_p10 }
  0x9f   : > { %p1593_p1 = pnand %p1592_p7, %p1586_p8 }
  0xa1   : > { %1596 = shalt.err (!%p1593_p1)
}
  0xa2   : > { %1340 = dma.hbm_to_vmem [thread:$0]  (!%p1915_p5), %s1911_s21, 128, %s1913_s25, %s388_s20  }
  0xa3   : > { %p2065_p11 = scmp.ne.s32.totalorder %s2058_s24, 0 }
  0xa4   : > { %s409_s15 = sand.u32 (!%p2065_p11), 1, %s1635_s18  }
  0xa5   : > { %407 = sbr.rel (%p2065_p11) target bundleno = 1282 (0x502), region = 64  ;;  %s1123_s17 = sshll.u32 (!%p2065_p11), %s409_s15, 3 }
  0xa6   : > { %s410_s26 = scalar_lea.sflag (!%p2065_p11), [#allocation3], %s409_s15  ;;  %s413_s22 = scalar_lea.vmem (!%p2065_p11), [#allocation2], %s1123_s17 }
  0xac   : > { %1614 = dma.done.wait (%p1901_p4), %s410_s26, 128  }
  0xad   : > { %1616 = vsyncadd (%p1901_p4), %s410_s26, 4294967168  ;;  %p2066_p9 = scmp.eq.s32.totalorder %s1736_s23, 0 }
  0xaf   : > { %1618 = dma.done.wait (%p2066_p9), [#allocation5], 1280   ;;  %p2067_p3 = pmov %p2066_p9 }
  0xb1   : > { %1620 = vsyncadd (%p2067_p3), [#allocation5], 4294966016  ;;  %p2068_p5 = pmov %p2067_p3 }
  0xb2   : > { %p2069_p13 = pmov %p2067_p3 }
  0xb3   : > { %1622 = dma.done.wait (%p2068_p5), [#allocation8], 2048  }
  0xb4   : > { %1624 = vsyncadd (%p2069_p13), [#allocation8], 4294965248  ;;  %p2070_p0 = pmov %p2067_p3 }
  0xb6   : > { %1626 = dma.done.wait (%p2070_p0), [#allocation11], 1024   ;;  %p2071_p2 = pmov %p2070_p0 }
  0xb7   : > { %v1653_v0 = vmov 0.0   ;;  %vm1654_vm0 = vmmov 0   ;;  %v1393_v1 = vld [vmem:[#allocation4] sm:$0xff]   ;;  %v1394_v2 = vld [vmem:[#allocation4 + $0x8] sm:$0xff]   ;;  %v476_v3 = vld [vmem:[%s413_s22] sm:$0xff]  ;;  %vm501_vm1 = vcmask 261120  }
  0xb8   : > { %1628 = vsyncadd (%p2071_p2), [#allocation11], 4294966272  ;;  %1211 = vmatprep.subr.bf16.mxu0 %v1653_v0  ;;  %1215 = vmatprep.mubr.msk.bf16.mxu0 %vm1654_vm0, %v1653_v0  ;;  %v1395_v4 = vld [vmem:[#allocation6] sm:$0xff]   ;;  %v477_v5 = vpack.c.bf16 %v476_v3, %v476_v3  ;;  %v1396_v6 = vld [vmem:[#allocation6 + $0x8] sm:$0xff]   ;;  %s2072_s16 = sld [smem:[#allocation17_spill]]  ;;  %p471_p4 = scmp.lt.s32.totalorder %s1736_s23, 1 }
  0xb9   : > { %1219 = vmatprep.subr.bf16.mxu1 %v1653_v0  ;;  %1235 = vmatprep.mubr.msk.bf16.mxu1 %vm1654_vm0, %v1653_v0  ;;  %v1397_v7 = vld [vmem:[#allocation6 + $0x10] sm:$0xff]   ;;  %v1398_v8 = vld [vmem:[#allocation6 + $0x18] sm:$0xff]   ;;  %v1399_v9 = vld [vmem:[#allocation6 + $0x20] sm:$0xff]   ;;  %s2073_s30 = sld [smem:[#allocation18_spill]]  ;;  %s2074_s17 = sld [smem:[#allocation19_spill]] }
  0xba   : > { %1212 = vmatpush3.bf16.msra.mxu0 %v1393_v1  ;;  %1220 = vmatpush3.bf16.msra.mxu1 %v1395_v4  ;;  %v1400_v10 = vld [vmem:[#allocation6 + $0x28] sm:$0xff]   ;;  %v1401_v11 = vld [vmem:[#allocation6 + $0x30] sm:$0xff]   ;;  %v1402_v12 = vld [vmem:[#allocation6 + $0x38] sm:$0xff]   ;;  %s2080_s23 = smov (!%p471_p4, %s1736_s23), 1 }
  0xbb   : > { %1213 = vmatprep.subr.bf16.mxu0 %v1653_v0  ;;  %1221 = vmatprep.subr.bf16.mxu1 %v1653_v0  ;;  %v1403_v13 = vld [vmem:[#allocation7] sm:$0xff]   ;;  %v1404_v14 = vld [vmem:[#allocation7 + $0x8] sm:$0xff]   ;;  %v1405_v15 = vld [vmem:[#allocation7 + $0x10] sm:$0xff]   ;;  %s1129_s12 = sshll.u32 %s2080_s23, 2 }
  0xbc   : > { %v1406_v16 = vld [vmem:[#allocation7 + $0x18] sm:$0xff]   ;;  %v1407_v17 = vld [vmem:[#allocation7 + $0x20] sm:$0xff]   ;;  %v1408_v18 = vld [vmem:[#allocation7 + $0x28] sm:$0xff]  }
  0xbd   : > { %v1130_v19 = vld [vmem:[%s2042_s2] ss:$0 sm:$0xff]  ;;  %v1409_v27 = vld [vmem:[#allocation7 + $0x30] sm:$0xff]   ;;  %v1411_v29 = vld [vmem:[#allocation9] sm:$0xff]  }
  0xbe   : > { %1214 = vmatpush3.bf16.msra.mxu0 %v1394_v2  ;;  %1222 = vmatpush3.bf16.msra.mxu1 %v1396_v6  ;;  %v1410_v28 = vld [vmem:[#allocation7 + $0x38] sm:$0xff]   ;;  %v1412_v30 = vld [vmem:[#allocation9 + $0x8] sm:$0xff]   ;;  %v1413_v31 = vld [vmem:[#allocation9 + $0x10] sm:$0xff]  }
  0xbf   : > { %1239 = vmatprep.subr.bf16.mxu0 %v1653_v0  ;;  %1223 = vmatprep.subr.bf16.mxu1 %v1653_v0  ;;  %v1414_v32 = vld [vmem:[#allocation9 + $0x18] sm:$0xff]   ;;  %v1415_v33 = vld [vmem:[#allocation9 + $0x20] sm:$0xff]   ;;  %v1416_v34 = vld [vmem:[#allocation9 + $0x28] sm:$0xff]   ;;  %s474_s26 = scalar_lea.vmem %s2074_s17, %s1129_s12 }
  0xc0   : > { %v1134_v35 = vld [vmem:[%s2044_s4] ss:$0 sm:$0xff]  ;;  %v1417_v43 = vld [vmem:[#allocation9 + $0x30] sm:$0xff]   ;;  %v1419_v45 = vld [vmem:[#allocation10] sm:$0xff]  }
  0xc1   : > { %1216 = vmatmul.mubr.msk.bf16.vlgmr.msra.gmra.mrb[0].mxu0 %vm501_vm1, %v477_v5  ;;  %v1418_v44 = vld [vmem:[#allocation9 + $0x38] sm:$0xff]   ;;  %v1420_v46 = vld [vmem:[#allocation10 + $0x8] sm:$0xff]   ;;  %v1421_v47 = vld [vmem:[#allocation10 + $0x10] sm:$0xff]  }
  0xc2   : > { %1255 = vmatprep.mubr.msk.bf16.mxu0 %vm1654_vm0, %v1653_v0  ;;  %1224 = vmatpush3.bf16.msra.mxu1 %v1397_v7  ;;  %v1422_v48 = vld [vmem:[#allocation10 + $0x18] sm:$0xff]   ;;  %v1423_v49 = vld [vmem:[#allocation10 + $0x20] sm:$0xff]   ;;  %v1424_v50 = vld [vmem:[#allocation10 + $0x28] sm:$0xff]  }
  0xc3   : > { %1225 = vmatprep.subr.bf16.mxu1 %v1653_v0  ;;  %1240 = vmatpush3.bf16.msra.mxu0 %v1403_v13  ;;  %v1143_v51 = vld [vmem:[%s2046_s6] ss:$0 sm:$0xff]  ;;  %v1425_v59 = vld [vmem:[#allocation10 + $0x30] sm:$0xff]  }
  0xc4   : > { %1241 = vmatprep.subr.bf16.mxu0 %v1653_v0  ;;  %v1426_v60 = vld [vmem:[#allocation10 + $0x38] sm:$0xff]  }
  0xc5   : > { %v1152_v61 = vld [vmem:[%s2072_s16] ss:$0 sm:$0xff] }
  0xc6   : > { %1226 = vmatpush3.bf16.msra.mxu1 %v1398_v8 }
  0xc7   : > { %1227 = vmatprep.subr.bf16.mxu1 %v1653_v0  ;;  %1242 = vmatpush3.bf16.msra.mxu0 %v1404_v14 }
  0xc8   : > { %1243 = vmatprep.subr.bf16.mxu0 %v1653_v0 }
  0xca   : > { %1228 = vmatpush3.bf16.msra.mxu1 %v1399_v9 }
  0xcb   : > { %1229 = vmatprep.subr.bf16.mxu1 %v1653_v0  ;;  %1244 = vmatpush3.bf16.msra.mxu0 %v1405_v15 }
  0xcc   : > { %1245 = vmatprep.subr.bf16.mxu0 %v1653_v0 }
  0xce   : > { %1230 = vmatpush3.bf16.msra.mxu1 %v1400_v10 }
  0xcf   : > { %1231 = vmatprep.subr.bf16.mxu1 %v1653_v0  ;;  %1246 = vmatpush3.bf16.msra.mxu0 %v1406_v16 }
  0xd0   : > { %1247 = vmatprep.subr.bf16.mxu0 %v1653_v0 }
  0xd2   : > { %1232 = vmatpush3.bf16.msra.mxu1 %v1401_v11 }
  0xd3   : > { %1233 = vmatprep.subr.bf16.mxu1 %v1653_v0  ;;  %1248 = vmatpush3.bf16.msra.mxu0 %v1407_v17 }
  0xd4   : > { %1249 = vmatprep.subr.bf16.mxu0 %v1653_v0 }
  0xd6   : > { %1234 = vmatpush3.bf16.msra.mxu1 %v1402_v12 }
  0xd7   : > { %1259 = vmatprep.subr.bf16.mxu1 %v1653_v0  ;;  %1250 = vmatpush3.bf16.msra.mxu0 %v1408_v18 }
  0xd8   : > { %1251 = vmatprep.subr.bf16.mxu0 %v1653_v0 }
  0xdb   : > { %1252 = vmatpush3.bf16.msra.mxu0 %v1409_v27 }
  0xdc   : > { %1253 = vmatprep.subr.bf16.mxu0 %v1653_v0 }
  0xdf   : > { %1254 = vmatpush3.bf16.msra.mxu0 %v1410_v28 }
  0xe0   : > { %1279 = vmatprep.subr.bf16.mxu0 %v1653_v0 }
 0x194   : > { %v539_v20 = vpop.f32.mrb[0].mxu0 }
 0x195   : > { %v540_v21 = vadd.f32 %v1130_v19, %v539_v20  ;;  %v1217_v22 = vpop.f32.mrb[1].mxu0 }
 0x196   : > { %v542_v23 = vpop.f32.mrb[2].mxu0 }
 0x197   : > { %v545_v24 = vmax.f32 %v540_v21, 0.0  ;;  %v1218_v25 = vpop.f32.mrb[3].mxu0 }
 0x199   : > { %v546_v26 = vpack.c.bf16 %v545_v24, %v545_v24 }
 0x19b   : > { %1236 = vmatmul.mubr.bf16.vlgmr.msra.gmra.mrb[0].mxu1 %v546_v26 }
 0x19c   : > { %1275 = vmatprep.mubr.msk.bf16.mxu1 %vm1654_vm0, %v1653_v0  ;;  %1260 = vmatpush3.bf16.msra.mxu1 %v1411_v29 }
 0x19d   : > { %1261 = vmatprep.subr.bf16.mxu1 %v1653_v0 }
 0x1a0   : > { %1262 = vmatpush3.bf16.msra.mxu1 %v1412_v30 }
 0x1a1   : > { %1263 = vmatprep.subr.bf16.mxu1 %v1653_v0 }
 0x1a4   : > { %1264 = vmatpush3.bf16.msra.mxu1 %v1413_v31 }
 0x1a5   : > { %1265 = vmatprep.subr.bf16.mxu1 %v1653_v0 }
 0x1a8   : > { %1266 = vmatpush3.bf16.msra.mxu1 %v1414_v32 }
 0x1a9   : > { %1267 = vmatprep.subr.bf16.mxu1 %v1653_v0 }
 0x1ac   : > { %1268 = vmatpush3.bf16.msra.mxu1 %v1415_v33 }
 0x1ad   : > { %1269 = vmatprep.subr.bf16.mxu1 %v1653_v0 }
 0x1b0   : > { %1270 = vmatpush3.bf16.msra.mxu1 %v1416_v34 }
 0x1b1   : > { %1271 = vmatprep.subr.bf16.mxu1 %v1653_v0 }
 0x1b4   : > { %1272 = vmatpush3.bf16.msra.mxu1 %v1417_v43 }
 0x1b5   : > { %1273 = vmatprep.subr.bf16.mxu1 %v1653_v0 }
 0x1b8   : > { %1274 = vmatpush3.bf16.msra.mxu1 %v1418_v44 }
 0x26e   : > { %v652_v36 = vpop.f32.mrb[0].mxu1 }
 0x26f   : > { %v653_v37 = vadd.f32 %v1134_v35, %v652_v36  ;;  %v1237_v38 = vpop.f32.mrb[1].mxu1 }
 0x270   : > { %v655_v39 = vpop.f32.mrb[2].mxu1 }
 0x271   : > { %v658_v40 = vmax.f32 %v653_v37, 0.0  ;;  %v1238_v41 = vpop.f32.mrb[3].mxu1 }
 0x273   : > { %v659_v42 = vpack.c.bf16 %v658_v40, %v658_v40 }
 0x275   : > { %1256 = vmatmul.mubr.bf16.vlgmr.msra.gmra.mrb[4].mxu0 %v659_v42 }
 0x276   : > { %1295 = vmatprep.mubr.msk.bf16.mxu0 %vm1654_vm0, %v1653_v0  ;;  %1280 = vmatpush3.bf16.msra.mxu0 %v1419_v45 }
 0x277   : > { %1281 = vmatprep.subr.bf16.mxu0 %v1653_v0 }
 0x27a   : > { %1282 = vmatpush3.bf16.msra.mxu0 %v1420_v46 }
 0x27b   : > { %1283 = vmatprep.subr.bf16.mxu0 %v1653_v0 }
 0x27e   : > { %1284 = vmatpush3.bf16.msra.mxu0 %v1421_v47 }
 0x27f   : > { %1285 = vmatprep.subr.bf16.mxu0 %v1653_v0 }
 0x282   : > { %1286 = vmatpush3.bf16.msra.mxu0 %v1422_v48 }
 0x283   : > { %1287 = vmatprep.subr.bf16.mxu0 %v1653_v0 }
 0x286   : > { %1288 = vmatpush3.bf16.msra.mxu0 %v1423_v49 }
 0x287   : > { %1289 = vmatprep.subr.bf16.mxu0 %v1653_v0 }
 0x28a   : > { %1290 = vmatpush3.bf16.msra.mxu0 %v1424_v50 }
 0x28b   : > { %1291 = vmatprep.subr.bf16.mxu0 %v1653_v0 }
 0x28e   : > { %1292 = vmatpush3.bf16.msra.mxu0 %v1425_v59 }
 0x28f   : > { %1293 = vmatprep.subr.bf16.mxu0 %v1653_v0  ;;  %v1161_v0 = vld [vmem:[%s2073_s30] ss:$0 sm:$0xff] }
 0x292   : > { %1294 = vmatpush3.bf16.msra.mxu0 %v1426_v60 }
 0x348   : > { %v765_v52 = vpop.f32.mrb[4].mxu0 }
 0x349   : > { %v766_v53 = vadd.f32 %v1143_v51, %v765_v52  ;;  %v1257_v54 = vpop.f32.mrb[5].mxu0 }
 0x34a   : > { %v768_v55 = vpop.f32.mrb[6].mxu0 }
 0x34b   : > { %v771_v56 = vmax.f32 %v766_v53, 0.0  ;;  %v1258_v57 = vpop.f32.mrb[7].mxu0 }
 0x34d   : > { %v772_v58 = vpack.c.bf16 %v771_v56, %v771_v56 }
 0x34f   : > { %1276 = vmatmul.mubr.bf16.vlgmr.msra.gmra.mrb[4].mxu1 %v772_v58 }
 0x422   : > { %v878_v62 = vpop.f32.mrb[4].mxu1 }
 0x423   : > { %v879_v63 = vadd.f32 %v1152_v61, %v878_v62  ;;  %v1277_v1 = vpop.f32.mrb[5].mxu1 }
 0x424   : > { %v881_v2 = vpop.f32.mrb[6].mxu1 }
 0x425   : > { %v884_v3 = vmax.f32 %v879_v63, 0.0  ;;  %v1278_v4 = vpop.f32.mrb[7].mxu1 }
 0x427   : > { %v885_v5 = vpack.c.bf16 %v884_v3, %v884_v3 }
 0x429   : > { %1296 = vmatmul.mubr.bf16.vlgmr.msra.gmra.mrb[8].mxu0 %v885_v5 }
 0x4fc   : > { %v991_v6 = vpop.f32.mrb[8].mxu0 }
 0x4fd   : > { %v992_v7 = vadd.f32 %v1161_v0, %v991_v6  ;;  %v1297_v8 = vpop.f32.mrb[9].mxu0 }
 0x4fe   : > { %v994_v9 = vpop.f32.mrb[10].mxu0 }
 0x4ff   : > { %v997_v10 = vpack.c.bf16 %v992_v7, %v992_v7  ;;  %v1298_v11 = vpop.f32.mrb[11].mxu0 }
 0x501   : > { %998 = vst [vmem:[%s474_s26] sm:$0xf] %v997_v10 }
 0x502 PF: > { %p24_p6 = scmp.ge.s32.totalorder %s1886_s27, 4   ;;  %s2075_s17 = smov %s1635_s18 }
 0x503   : > { %s2076_s18 = smov %s1639_s19  ;;  %s2077_s19 = smov %s1897_s8 }
 0x504   : > { %s2078_s20 = smov %s1886_s27  ;;  %26 = sbr.rel (!%p24_p6) target bundleno = 11 (0xb), region = 124 }
 0x50b   :  { %1018 = vsyncpa [#allocation3], 1 }
 0x50c   :  { %1020 = vsyncpa [#allocation3 + $0x1], 1 }
 0x50d   :  { %1021 = vsyncpa [#allocation5], 1 }
 0x50e   :  { %1022 = vsyncpa [#allocation8], 1 }
 0x50f   :  { %1023 = vsyncpa [#allocation11], 1 }

</bundles_post_ra>
